<compile_context>
chip_gen: v6e
topology: v6e:2x2x1
jax: 0.10.0
libtpu: 0.0.40
codegen_flags: <defaults>
</compile_context>

<pallas_src>
import jax
import jax.numpy as jnp
from jax.experimental import pallas as pl
from jax.experimental.pallas import tpu as pltpu


_VMEM_LIMIT = 40 << 20          # safe on v5e (128 MiB phys), v6e (128 MiB), v7x (64 MiB)
_TILE_BYTES_A = 8 << 20         # pass A: only x is double-buffered
_TILE_BYTES_B = 4 << 20         # pass B: x and out are both double-buffered
_FUSE_BYTES = 4 << 20           # fused path: f32 bytes of one (C, HW) sample slab


def _round_up(a, b):
    return ((a + b - 1) // b) * b


def _row_align(dtype):
    # sublane packing: f32 -> 8, bf16/f16 -> 16, int8/fp8 -> 32
    return {4: 8, 2: 16, 1: 32}.get(jnp.dtype(dtype).itemsize, 8)


def _row_tile(R, align, cap=256):
    """Aligned row tile; full-dim block for tiny R; >=2 row blocks when possible (v7x)."""
    if R <= align:
        return R                                   # full-dim block is always legal
    tm = min(cap, (R // align) * align)            # aligned, never larger than R
    tm = min(tm, _round_up((R + 1) // 2, align))   # >= 2 blocks on the 'parallel' axis
    return max(tm, align)


def _col_tile(HW, TM, itemsize, budget_bytes, cap_override=None):
    """Spatial tile: full dim if it fits the budget, else a 128-aligned cap."""
    cap = cap_override
    if cap is None:
        cap = (budget_bytes // (TM * itemsize)) // 128 * 128
        cap = max(128, min(cap, 65536))
    return HW if HW <= cap else cap


# --------------------------------------------------------------------------------------
# Fused single-sweep kernel: grid over N, whole (C, HW) sample resident per step.
# --------------------------------------------------------------------------------------
def _make_fused_kernel(C, HW, eps):
    inv_hw = 1.0 / float(HW)

    def kernel(gamma_ref, alpha_ref, beta_ref, x_ref, o_ref):
        x = x_ref[0].astype(jnp.float32)                         # (C, HW)
        mean_c = jnp.sum(x, axis=1, keepdims=True) * inv_hw      # (C, 1)
        xc = x - mean_c
        var_c = jnp.sum(xc * xc, axis=1, keepdims=True) * inv_hw  # biased (InstanceNorm)
        rstd_c = jax.lax.rsqrt(var_c + eps)
        # cross-channel stats of the per-channel means (torch.var default: ddof=1)
        m = jnp.mean(mean_c, axis=0, keepdims=True)               # (1, 1)
        d = mean_c - m
        v = jnp.sum(d * d, axis=0, keepdims=True) / (C - 1)
        means_n = d * jax.lax.rsqrt(v + eps)                      # (C, 1)

        gamma = gamma_ref[0]                                      # (C, 1)
        alpha = alpha_ref[0]
        beta = beta_ref[0]
        scale = gamma * rstd_c
        shift = gamma * (means_n * alpha) + beta
        o_ref[0] = (xc * scale + shift).astype(o_ref.dtype)

    return kernel


def _fused_forward(x, gamma, alpha, beta, N, C, HW, eps):
    x3 = x.reshape(N, C, HW)
    g3 = gamma.reshape(N, C, 1)
    a3 = alpha.reshape(N, C, 1)
    b3 = beta.reshape(N, C, 1)

    param_spec = pl.BlockSpec((1, C, 1), lambda n: (n, 0, 0))
    out3 = pl.pallas_call(
        _make_fused_kernel(C, HW, eps),
        out_shape=jax.ShapeDtypeStruct((N, C, HW), x.dtype),
        grid_spec=pltpu.PrefetchScalarGridSpec(
            num_scalar_prefetch=0,
            grid=(N,),
            in_specs=[
                param_spec, param_spec, param_spec,
                pl.BlockSpec((1, C, HW), lambda n: (n, 0, 0)),
            ],
            out_specs=pl.BlockSpec((1, C, HW), lambda n: (n, 0, 0)),
        ),
        compiler_params=pltpu.CompilerParams(
            dimension_semantics=("parallel",),
            vmem_limit_bytes=_VMEM_LIMIT,
        ),
    )(g3, a3, b3, x3)
    return out3.reshape(x.shape)


# --------------------------------------------------------------------------------------
# Two-pass streaming path for large samples.
# --------------------------------------------------------------------------------------
def _make_row_stats_kernel(HW, TN, ragged):
    def kernel(x_ref, sum_ref, sq_ref):
        j = pl.program_id(1)

        @pl.when(j == 0)
        def _():
            sum_ref[...] = jnp.zeros_like(sum_ref)
            sq_ref[...] = jnp.zeros_like(sq_ref)

        xt = x_ref[...].astype(jnp.float32)
        if ragged:  # mask OOB lanes of the last spatial tile before summing
            col = jax.lax.broadcasted_iota(jnp.int32, (1, TN), 1) + j * TN
            xt = jnp.where(col < HW, xt, 0.0)
        sum_ref[...] += jnp.sum(xt, axis=1, keepdims=True)
        sq_ref[...] += jnp.sum(xt * xt, axis=1, keepdims=True)

    return kernel


def _make_affine_kernel(TM):
    def kernel(scale_ref, shift_ref, x_ref, o_ref):
        i = pl.program_id(0)
        r0 = pl.multiple_of(i * TM, TM)
        sc = scale_ref[pl.ds(r0, TM), :]       # (TM, 1), sliced from resident VMEM array
        sh = shift_ref[pl.ds(r0, TM), :]
        o_ref[...] = (x_ref[...].astype(jnp.float32) * sc + sh).astype(o_ref.dtype)

    return kernel


def _two_pass_forward(x, gamma, alpha, beta, N, C, HW, eps, tn_caps=None):
    R = N * C
    x2 = x.reshape(R, HW)
    itemsize = jnp.dtype(x.dtype).itemsize
    TM = _row_tile(R, _row_align(x.dtype))
    cap_a, cap_b = tn_caps if tn_caps is not None else (None, None)

    # ---- Pass A: per-(n, c) spatial sum / sum-of-squares (streaming reduction) ----
    TN_A = _col_tile(HW, TM, itemsize, _TILE_BYTES_A, cap_a)
    grid_a = (pl.cdiv(R, TM), pl.cdiv(HW, TN_A))
    ragged = (HW % TN_A) != 0
    row_sum, row_sq = pl.pallas_call(
        _make_row_stats_kernel(HW, TN_A, ragged),
        out_shape=(
            jax.ShapeDtypeStruct((R, 1), jnp.float32),
            jax.ShapeDtypeStruct((R, 1), jnp.float32),
        ),
        grid_spec=pltpu.PrefetchScalarGridSpec(
            num_scalar_prefetch=0,
            grid=grid_a,
            in_specs=[pl.BlockSpec((TM, TN_A), lambda i, j: (i, j))],
            out_specs=[
                pl.BlockSpec((TM, 1), lambda i, j: (i, 0)),
                pl.BlockSpec((TM, 1), lambda i, j: (i, 0)),
            ],
        ),
        compiler_params=pltpu.CompilerParams(
            dimension_semantics=("parallel", "arbitrary"),
            vmem_limit_bytes=_VMEM_LIMIT,
        ),
    )(x2)

    # ---- Tiny (N, C) glue math in plain JAX: stats -> per-row scale/shift ----
    inv_hw = 1.0 / float(HW)
    mean_nc = (row_sum[:, 0] * inv_hw).reshape(N, C)
    msq_nc = (row_sq[:, 0] * inv_hw).reshape(N, C)
    # TODO(synk): E[x^2]-E[x]^2 can cancel when |mean| >> std; the fused path avoids it.
    var_nc = jnp.maximum(msq_nc - mean_nc * mean_nc, 0.0)        # biased (InstanceNorm)
    rstd_nc = jax.lax.rsqrt(var_nc + eps)
    m = jnp.mean(mean_nc, axis=-1, keepdims=True)
    v = jnp.var(mean_nc, axis=-1, keepdims=True, ddof=1)         # torch.var default
    means_n = (mean_nc - m) / jnp.sqrt(v + eps)
    # out = gamma * ((x - mean) * rstd + means_n * alpha) + beta
    #     = (gamma * rstd) * x + (gamma * (means_n * alpha - mean * rstd) + beta)
    scale = gamma * rstd_nc
    shift = gamma * (means_n * alpha - mean_nc * rstd_nc) + beta

    # pad only the tiny (R, 1) per-row vectors to whole row tiles (negligible bytes)
    R_pad = pl.cdiv(R, TM) * TM
    scale_rows = scale.reshape(R, 1)
    shift_rows = shift.reshape(R, 1)
    if R_pad != R:
        scale_rows = jnp.pad(scale_rows, ((0, R_pad - R), (0, 0)))
        shift_rows = jnp.pad(shift_rows, ((0, R_pad - R), (0, 0)))

    # ---- Pass B: lane-dense streaming affine  out = scale_row * x + shift_row ----
    TN_B = _col_tile(HW, TM, itemsize, _TILE_BYTES_B, cap_b)
    grid_b = (pl.cdiv(R, TM), pl.cdiv(HW, TN_B))
    out2 = pl.pallas_call(
        _make_affine_kernel(TM),
        out_shape=jax.ShapeDtypeStruct((R, HW), x.dtype),
        grid_spec=pltpu.PrefetchScalarGridSpec(
            num_scalar_prefetch=0,
            grid=grid_b,
            in_specs=[
                pl.BlockSpec(memory_space=pltpu.MemorySpace.VMEM),   # scale (resident)
                pl.BlockSpec(memory_space=pltpu.MemorySpace.VMEM),   # shift (resident)
                pl.BlockSpec((TM, TN_B), lambda i, j: (i, j)),       # x tile
            ],
            out_specs=pl.BlockSpec((TM, TN_B), lambda i, j: (i, j)),
        ),
        compiler_params=pltpu.CompilerParams(
            dimension_semantics=("parallel", "parallel"),
            vmem_limit_bytes=_VMEM_LIMIT,
        ),
    )(scale_rows, shift_rows, x2)
    return out2.reshape(x.shape)


# --------------------------------------------------------------------------------------
# Public wrapper
# --------------------------------------------------------------------------------------
def conditional_instance_norm1d_plus(x, y, embed_weight, num_features, bias=True,
                                     eps=1e-5, force_two_pass=False, _tn_caps=None):
    """x: (N, C, *spatial); y: (N,) int; embed_weight: (classes, 3C) if bias else (classes, 2C)."""
    N, C = int(x.shape[0]), int(x.shape[1])
    assert C == num_features
    HW = 1
    for s in x.shape[2:]:
        HW *= int(s)

    # tiny embedding gather stays in plain JAX
    emb = embed_weight[y].astype(jnp.float32)                    # (N, 2C or 3C)
    gamma = emb[:, :C]
    alpha = emb[:, C:2 * C]
    beta = emb[:, 2 * C:] if bias else jnp.zeros((N, C), jnp.float32)

    fuse = (not force_two_pass) and (C * HW * 4 <= _FUSE_BYTES)
    if fuse:
        return _fused_forward(x, gamma, alpha, beta, N, C, HW, eps)
    return _two_pass_forward(x, gamma, alpha, beta, N, C, HW, eps, tn_caps=_tn_caps)


# --------------------------------------------------------------------------------------
# Self-test
# --------------------------------------------------------------------------------------
def _reference(x, y, embed_weight, C, bias, eps=1e-5):
    emb = embed_weight[y]
    gamma = emb[:, :C]
    alpha = emb[:, C:2 * C]
    beta = emb[:, 2 * C:] if bias else jnp.zeros_like(gamma)
    mean_nc = x.mean(axis=(2, 3))
    m = mean_nc.mean(axis=-1, keepdims=True)
    v = jnp.var(mean_nc, axis=-1, keepdims=True, ddof=1)
    means_n = (mean_nc - m) / jnp.sqrt(v + eps)
    mu = x.mean(axis=(2, 3), keepdims=True)
    var = x.var(axis=(2, 3), keepdims=True)
    h = (x - mu) / jnp.sqrt(var + eps)
    h = h + (means_n * alpha)[:, :, None, None]
    return gamma[:, :, None, None] * h + beta[:, :, None, None]


if __name__ == "__main__":
    key = jax.random.PRNGKey(0)
    k1, k2, k3, k4, k5, k6 = jax.random.split(key, 6)
    num_classes = 10

    # --- Test 1: fused single-sweep path (sample fits VMEM), bias=True ---
    N, C, H, W = 2, 4, 16, 16
    x = jax.random.normal(k1, (N, C, H, W), dtype=jnp.float32)
    y = jax.random.randint(k2, (N,), 0, num_classes, dtype=jnp.int32)
    # embed.weight init (bias=True): first 2C ~ Normal(1, 0.02), last C zeros.
    ga = 1.0 + 0.02 * jax.random.normal(k3, (num_classes, 2 * C), dtype=jnp.float32)
    embed_weight = jnp.concatenate(
        [ga, jnp.zeros((num_classes, C), jnp.float32)], axis=-1)   # (classes, 3C)
    out = jax.block_until_ready(
        conditional_instance_norm1d_plus(x, y, embed_weight, num_features=C, bias=True))
    ref = _reference(x, y, embed_weight, C, bias=True)
    assert out.shape == x.shape
    assert jnp.allclose(out, ref, atol=1e-4, rtol=1e-4), float(jnp.max(jnp.abs(out - ref)))

    # --- Test 2: forced two-pass streaming path with ragged tiles, bias=False ---
    N2, C2, H2, W2 = 2, 6, 10, 13                                  # HW=130, R=12 (ragged)
    x2 = jax.random.normal(k4, (N2, C2, H2, W2), dtype=jnp.float32)
    y2 = jax.random.randint(k5, (N2,), 0, num_classes, dtype=jnp.int32)
    embed_weight2 = 1.0 + 0.02 * jax.random.normal(
        k6, (num_classes, 2 * C2), dtype=jnp.float32)               # bias=False: (classes, 2C)
    out2 = jax.block_until_ready(
        conditional_instance_norm1d_plus(x2, y2, embed_weight2, num_features=C2, bias=False,
                                         force_two_pass=True, _tn_caps=(128, 128)))
    ref2 = _reference(x2, y2, embed_weight2, C2, bias=False)
    assert out2.shape == x2.shape
    assert jnp.allclose(out2, ref2, atol=1e-4, rtol=1e-4), float(jnp.max(jnp.abs(out2 - ref2)))

    print("KERNEL_OK")
</pallas_src>

<mosaic_0001>
module attributes {stable_mosaic.version = 11 : i64} {
  func.func @kernel(%arg0: i32, %arg1: memref<1x4x1xf32, #tpu.memory_space<vmem>>, %arg2: memref<1x4x1xf32, #tpu.memory_space<vmem>>, %arg3: memref<1x4x1xf32, #tpu.memory_space<vmem>>, %arg4: memref<1x4x256xf32, #tpu.memory_space<vmem>>, %arg5: memref<1x4x256xf32, #tpu.memory_space<vmem>>) attributes {dimension_semantics = [#tpu.dimension_semantics<parallel>], iteration_bounds = array<i64: 2>, scalar_prefetch = 0 : i64, scratch_operands = 0 : i64, tpu.core_type = #tpu.core_type<tc>, window_params = [{transform_indices = @transform_0, window_bounds = array<i64: 1, 4, 1>}, {transform_indices = @transform_1, window_bounds = array<i64: 1, 4, 1>}, {transform_indices = @transform_2, window_bounds = array<i64: 1, 4, 1>}, {transform_indices = @transform_3, window_bounds = array<i64: 1, 4, 256>}, {transform_indices = @transform_4, window_bounds = array<i64: 1, 4, 256>}]} {
    %c0 = arith.constant 0 : index
    %c0_0 = arith.constant 0 : index
    %c0_1 = arith.constant 0 : index
    %0 = vector.load %arg4[%c0, %c0_0, %c0_1] : memref<1x4x256xf32, #tpu.memory_space<vmem>>, vector<1x4x256xf32>
    %1 = vector.shape_cast %0 : vector<1x4x256xf32> to vector<4x256xf32>
    %cst = arith.constant dense<0.000000e+00> : vector<4xf32>
    %2 = vector.multi_reduction <add>, %1, %cst [1] : vector<4x256xf32> to vector<4xf32>
    %3 = vector.shape_cast %2 : vector<4xf32> to vector<4x1xf32>
    %cst_2 = arith.constant 3.906250e-03 : f32
    %4 = vector.broadcast %cst_2 : f32 to vector<4x1xf32>
    %5 = arith.mulf %3, %4 : vector<4x1xf32>
    %6 = vector.broadcast %5 : vector<4x1xf32> to vector<4x256xf32>
    %7 = arith.subf %1, %6 : vector<4x256xf32>
    %8 = arith.mulf %7, %7 : vector<4x256xf32>
    %cst_3 = arith.constant dense<0.000000e+00> : vector<4xf32>
    %9 = vector.multi_reduction <add>, %8, %cst_3 [1] : vector<4x256xf32> to vector<4xf32>
    %10 = vector.shape_cast %9 : vector<4xf32> to vector<4x1xf32>
    %cst_4 = arith.constant 3.906250e-03 : f32
    %11 = vector.broadcast %cst_4 : f32 to vector<4x1xf32>
    %12 = arith.mulf %10, %11 : vector<4x1xf32>
    %cst_5 = arith.constant 9.99999974E-6 : f32
    %13 = vector.broadcast %cst_5 : f32 to vector<4x1xf32>
    %14 = arith.addf %12, %13 : vector<4x1xf32>
    %15 = math.rsqrt %14 : vector<4x1xf32>
    %cst_6 = arith.constant dense<0.000000e+00> : vector<1xf32>
    %16 = vector.multi_reduction <add>, %5, %cst_6 [0] : vector<4x1xf32> to vector<1xf32>
    %17 = vector.shape_cast %16 : vector<1xf32> to vector<1x1xf32>
    %cst_7 = arith.constant 4.000000e+00 : f32
    %18 = vector.broadcast %cst_7 : f32 to vector<1x1xf32>
    %19 = arith.divf %17, %18 : vector<1x1xf32>
    %20 = vector.broadcast %19 : vector<1x1xf32> to vector<4x1xf32>
    %21 = arith.subf %5, %20 : vector<4x1xf32>
    %22 = arith.mulf %21, %21 : vector<4x1xf32>
    %cst_8 = arith.constant dense<0.000000e+00> : vector<1xf32>
    %23 = vector.multi_reduction <add>, %22, %cst_8 [0] : vector<4x1xf32> to vector<1xf32>
    %24 = vector.shape_cast %23 : vector<1xf32> to vector<1x1xf32>
    %cst_9 = arith.constant 3.000000e+00 : f32
    %25 = vector.broadcast %cst_9 : f32 to vector<1x1xf32>
    %26 = arith.divf %24, %25 : vector<1x1xf32>
    %cst_10 = arith.constant 9.99999974E-6 : f32
    %27 = vector.broadcast %cst_10 : f32 to vector<1x1xf32>
    %28 = arith.addf %26, %27 : vector<1x1xf32>
    %29 = math.rsqrt %28 : vector<1x1xf32>
    %30 = vector.broadcast %29 : vector<1x1xf32> to vector<4x1xf32>
    %31 = arith.mulf %21, %30 : vector<4x1xf32>
    %c0_11 = arith.constant 0 : index
    %c0_12 = arith.constant 0 : index
    %c0_13 = arith.constant 0 : index
    %32 = vector.load %arg1[%c0_11, %c0_12, %c0_13] : memref<1x4x1xf32, #tpu.memory_space<vmem>>, vector<1x4x1xf32>
    %33 = vector.shape_cast %32 : vector<1x4x1xf32> to vector<4x1xf32>
    %c0_14 = arith.constant 0 : index
    %c0_15 = arith.constant 0 : index
    %c0_16 = arith.constant 0 : index
    %34 = vector.load %arg2[%c0_14, %c0_15, %c0_16] : memref<1x4x1xf32, #tpu.memory_space<vmem>>, vector<1x4x1xf32>
    %35 = vector.shape_cast %34 : vector<1x4x1xf32> to vector<4x1xf32>
    %c0_17 = arith.constant 0 : index
    %c0_18 = arith.constant 0 : index
    %c0_19 = arith.constant 0 : index
    %36 = vector.load %arg3[%c0_17, %c0_18, %c0_19] : memref<1x4x1xf32, #tpu.memory_space<vmem>>, vector<1x4x1xf32>
    %37 = vector.shape_cast %36 : vector<1x4x1xf32> to vector<4x1xf32>
    %38 = arith.mulf %33, %15 : vector<4x1xf32>
    %39 = arith.mulf %31, %35 : vector<4x1xf32>
    %40 = arith.mulf %33, %39 : vector<4x1xf32>
    %41 = arith.addf %40, %37 : vector<4x1xf32>
    %42 = vector.broadcast %38 : vector<4x1xf32> to vector<4x256xf32>
    %43 = arith.mulf %7, %42 : vector<4x256xf32>
    %44 = vector.broadcast %41 : vector<4x1xf32> to vector<4x256xf32>
    %45 = arith.addf %43, %44 : vector<4x256xf32>
    %c0_20 = arith.constant 0 : index
    %c0_21 = arith.constant 0 : index
    %c0_22 = arith.constant 0 : index
    %46 = vector.load %arg5[%c0_20, %c0_21, %c0_22] : memref<1x4x256xf32, #tpu.memory_space<vmem>>, vector<1x4x256xf32>
    %47 = vector.shape_cast %46 : vector<1x4x256xf32> to vector<4x256xf32>
    %48 = vector.shape_cast %45 : vector<4x256xf32> to vector<1x4x256xf32>
    tpu.vector_store %arg5[%c0_20, %c0_21, %c0_22], %48 {strides = array<i32>} : memref<1x4x256xf32, #tpu.memory_space<vmem>>, vector<1x4x256xf32>,
    return
  }
  func.func @transform_0(%arg0: i32) -> (i32, i32, i32) {
    %c0_i32 = arith.constant 0 : i32
    %c0_i32_0 = arith.constant 0 : i32
    %c0_i32_1 = arith.constant 0 : i32
    return %arg0, %c0_i32, %c0_i32_0 : i32, i32, i32
  }
  func.func @transform_1(%arg0: i32) -> (i32, i32, i32) {
    %c0_i32 = arith.constant 0 : i32
    %c0_i32_0 = arith.constant 0 : i32
    %c0_i32_1 = arith.constant 0 : i32
    return %arg0, %c0_i32, %c0_i32_0 : i32, i32, i32
  }
  func.func @transform_2(%arg0: i32) -> (i32, i32, i32) {
    %c0_i32 = arith.constant 0 : i32
    %c0_i32_0 = arith.constant 0 : i32
    %c0_i32_1 = arith.constant 0 : i32
    return %arg0, %c0_i32, %c0_i32_0 : i32, i32, i32
  }
  func.func @transform_3(%arg0: i32) -> (i32, i32, i32) {
    %c0_i32 = arith.constant 0 : i32
    %c0_i32_0 = arith.constant 0 : i32
    %c0_i32_1 = arith.constant 0 : i32
    return %arg0, %c0_i32, %c0_i32_0 : i32, i32, i32
  }
  func.func @transform_4(%arg0: i32) -> (i32, i32, i32) {
    %c0_i32 = arith.constant 0 : i32
    %c0_i32_0 = arith.constant 0 : i32
    %c0_i32_1 = arith.constant 0 : i32
    return %arg0, %c0_i32, %c0_i32_0 : i32, i32, i32
  }
}

</mosaic_0001>

<bundles_post_ra>
// kernel: tpu_custom_call.1
= control target key start
LH: loop header
LB: loop body
LE: loop exit
PB: predicated region body
PF: predicated region fallthrough
CT: control target
= control target key end

     0   :  { %9 = vsyncpa [#allocation3], 0  ;;  %s713_s0 = inlined_call_operand.vmem [shape: f32[2,4,1], index: 0, kind: input, shape index: {}]   ;;  %s714_s1 = inlined_call_operand.vmem [shape: f32[2,4,1], index: 1, kind: input, shape index: {}]   ;;  %s715_s2 = inlined_call_operand.vmem [shape: f32[2,4,1], index: 2, kind: input, shape index: {}]   ;;  %s716_s3 = inlined_call_operand.vmem [shape: f32[2,4,256], index: 3, kind: input, shape index: {}]   ;;  %s717_s4 = inlined_call_operand.hbm [shape: f32[2,4,256], index: 4, kind: output, shape index: {}]  }
   0x1   :  { %11 = vsyncpa [#allocation3 + $0x1], 0  ;;  %s602_s15 = smov 0   ;;  %s604_s16 = smov 0  }
   0x2   :  { %s606_s17 = smov 0   ;;  %s608_s18 = smov 0  }
   0x3 LB: > { %s623_s19 = sadd.s32 4294967295, %s572_s18   ;;  %s447_s20 = sadd.s32 4294967294, %s572_s18   ;;  %s572_s18 = sphi %s608_s18, %s723_s18   ;;  %s568_s17 = sphi %s606_s17, %s722_s17   ;;  %s564_s16 = sphi %s604_s16, %s721_s16   ;;  %s560_s15 = sphi %s602_s15, %s720_s15  }
   0x4   : > { %s627_s21 = sadd.s32 1, %s572_s18   ;;  %s128_s22 = sadd.s32 1, %s568_s17 }
   0x5   : > { %s125_s23 = ssub.s32 %s572_s18, %s627_s21  ;;  %p138_p0 = scmp.ne.s32.totalorder %s568_s17, %s564_s16 }
   0x6   : > { %p126_p1 = scmp.eq.s32.totalorder %s125_s23, 0  ;;  %p139_p2 = scmp.eq.s32.totalorder %s623_s19, 1 }
   0x7   : > { %p144_p3 = scmp.ne.s32.totalorder %s564_s16, %s560_s15  ;;  %p145_p4 = scmp.eq.s32.totalorder %s447_s20, 1 }
   0x8   : > { %s638_s24 = scalar_select %p126_p1, %s568_s17, %s128_s22  }
   0x9   : > { %p640_p5 = por %p139_p2, %p138_p0  ;;  %p644_p6 = por %p145_p4, %p144_p3 }
   0xa   : > { %p450_p7 = scmp.ge.s32.totalorder %s572_s18, 1  ;;  %p192_p8 = scmp.lt.s32.totalorder %s572_s18, 3 }
   0xc   : > { %p193_p9 = pnand %p450_p7, %p192_p8 }
   0xd   : > { %p230_p10 = scmp.lt.s32.totalorder (!%p193_p9), %s623_s19, 1  ;;  %s227_s22 = sand.u32 (!%p193_p9), 1, %s564_s16  }
   0xe   : > { %196 = sbr.rel (%p193_p9) target bundleno = 483 (0x1e3), region = 36  ;;  %s451_s23 = sshll.u32 (!%p193_p9), %s227_s22, 3 }
   0xf   : > { %s338_s7 = scalar_lea.sflag (!%p193_p9), [#allocation3], %s227_s22 }
  0x13   : > { %s652_s27 = scalar_select %p230_p10, %s623_s19, 1  ;;  %vm251_vm0 = vcmask 1043456   ;;  %v574_v5 = vmov 839922192   ;;  %v262_v7 = vlaneseq  ;;  %v575_v20 = vmov 0  }
  0x14   : > { %v260_v6 = vunpack.c.l.s4 %v574_v5  ;;  %505 = vset.pattern.permute.xlu1 %v575_v20  ;;  %506 = vset.pattern.permute.xlu0 %v575_v20 }
  0x15   : > { %s462_s28 = sshll.u32 %s652_s27, 3  ;;  %v263_v9 = vshrl.u32 %v262_v7, 7  ;;  %s452_s6 = sshll.u32 %s652_s27, 2 }
  0x16   : > { %s246_s5 = scalar_lea.vmem %s716_s3, %s462_s28  ;;  %v261_v8 = vunpack.c.0.s8 %v260_v6  ;;  %s237_s9 = scalar_lea.vmem %s714_s1, %s452_s6 }
  0x17   : > { %v247_v0 = vld [vmem:[%s246_s5] sm:$0xff]  ;;  %s233_s12 = scalar_lea.vmem %s713_s0, %s452_s6  ;;  %s241_s20 = scalar_lea.vmem %s715_s2, %s452_s6 }
  0x18   : > { %v249_v1 = vcombine.high %v247_v0, %v247_v0  ;;  %v252_v2 = vsel %vm251_vm0, %v247_v0, 0.0  ;;  %v660_v10 = vsub.s32 %v261_v8, %v263_v9  ;;  %v304_v45 = vld [vmem:[%s237_s9] sm:$0xf]  ;;  %s463_s27 = sshll.u32 %s623_s19, 7  ;;  %s229_s28 = scalar_lea.vmem [#allocation2], %s451_s23 }
  0x19   : > { %v303_v47 = vld [vmem:[%s233_s12] sm:$0xf]  ;;  %s352_s29 = sshll.u32 %s229_s28, 4  ;;  %s350_s6 = scalar_lea.hbm %s717_s4, %s463_s27  ;;  %s353_s29 = int_to_ptr.vmem [resolvable:$true] %s352_s29 }
  0x1a   : > { %v253_v3 = vsel %vm251_vm0, %v249_v1, 0.0  ;;  %v305_v51 = vld [vmem:[%s241_s20] sm:$0xf]  ;;  %s512_s8 = scalar_lea.vmem %s353_s29, 128  ;;  %s576_s9 = smov [#allocation2]  }
  0x1b   : > { %v254_v4 = vadd.f32 %v253_v3, %v252_v2  ;;  %p513_p11 = scmp.ne.s32.totalorder %s353_s29, %s512_s8  ;;  %s516_s19 = sshll.u32 %s576_s9, 4  ;;  %s517_s19 = int_to_ptr.vmem [resolvable:$false] %s516_s19 }
  0x1c   : > { %s518_s10 = scalar_lea.vmem %s517_s19, 256  ;;  %p519_p0 = scmp.lt.s32.totalorder %s353_s29, %s517_s19 }
  0x1d   : > { %255 = vadd.xlane.f32.xlu0 %v254_v4  ;;  %p514_p12 = pnand %p513_p11, %p640_p5  ;;  %p520_p1 = scmp.lt.s32.totalorder %s518_s10, %s512_s8 }
  0x1f   : > { %p515_p13 = pneg %p514_p12  ;;  %p521_p2 = por %p520_p1, %p519_p0 }
  0x21   : > { %p522_p3 = pnand %p521_p2, %p515_p13 }
  0xa6   : > { %v256_v11 = vpop.xlane.xlu0 %255 }
  0xa7   : > { %v257_v12 = vmul.f32 0.00390625, %v256_v11 }
  0xa9   : > { %v265_v13 = vrot.slane %v257_v12, %v660_v10  ;;  %v280_v21 = vsel %vm251_vm0, %v257_v12, 0.0 }
  0xaa   : > { %v281_v22 = vrot.slane %v280_v21, 4 }
  0xab   : > { %v267_v14 = vsub.f32 %v247_v0, %v265_v13 }
  0xac   : > { %v282_v23 = vadd.f32 %v281_v22, %v280_v21 }
  0xad   : > { %v268_v15 = vmul.f32 %v267_v14, %v267_v14 }
  0xae   : > { %v283_v24 = vrot.slane %v282_v23, 2 }
  0xaf   : > { %v270_v16 = vcombine.high %v268_v15, %v268_v15  ;;  %v272_v17 = vsel %vm251_vm0, %v268_v15, 0.0 }
  0xb0   : > { %v284_v25 = vadd.f32 %v283_v24, %v282_v23 }
  0xb1   : > { %v273_v18 = vsel %vm251_vm0, %v270_v16, 0.0 }
  0xb2   : > { %v274_v19 = vadd.f32 %v273_v18, %v272_v17  ;;  %v285_v26 = vrot.slane %v284_v25, 1 }
  0xb4   : > { %275 = vadd.xlane.f32.xlu0 %v274_v19  ;;  %v286_v27 = vadd.f32 %v285_v26, %v284_v25 }
  0xb6   : > { %v288_v28 = vmul.f32 0.25, %v286_v27 }
  0xb8   : > { %v289_v29 = vsub.f32 %v257_v12, %v288_v28 }
  0xba   : > { %v290_v30 = vmul.f32 %v289_v29, %v289_v29 }
  0xbc   : > { %v291_v31 = vsel %vm251_vm0, %v290_v30, 0.0 }
  0xbd   : > { %v292_v32 = vrot.slane %v291_v31, 4 }
  0xbf   : > { %v293_v33 = vadd.f32 %v292_v32, %v291_v31 }
  0xc1   : > { %v294_v34 = vrot.slane %v293_v33, 2 }
  0xc3   : > { %v295_v35 = vadd.f32 %v294_v34, %v293_v33 }
  0xc5   : > { %v296_v36 = vrot.slane %v295_v35, 1 }
  0xc7   : > { %v297_v37 = vadd.f32 %v296_v36, %v295_v35 }
  0xc9   : > { %v299_v38 = vmul.f32 0.33333334, %v297_v37 }
  0xcb   : > { %v300_v39 = vadd.f32 1e-05, %v299_v38 }
  0xcd   : > { %508 = vrsqrt.f32 %v300_v39 }
  0xda   : > { %v509_v43 = vpop.eup %508 }
  0xdb   : > { %v302_v44 = vmul.f32 %v509_v43, %v289_v29 }
  0xdd   : > { %v307_v46 = vmul.f32 %v304_v45, %v302_v44 }
  0xdf   : > { %v308_v50 = vmul.f32 %v307_v46, %v303_v47 }
  0xe1   : > { %v309_v52 = vadd.f32 %v308_v50, %v305_v51 }
 0x13d   : > { %v276_v40 = vpop.xlane.xlu0 %275 }
 0x13e   : > { %v277_v41 = vmul.f32 0.00390625, %v276_v40 }
 0x140   : > { %v278_v42 = vadd.f32 1e-05, %v277_v41 }
 0x142   : > { %510 = vrsqrt.f32 %v278_v42 }
 0x14f   : > { %v511_v48 = vpop.eup %510 }
 0x150   : > { %v306_v49 = vmul.f32 %v511_v48, %v303_v47 }
 0x152   : > { %312 = vperm.xlu1 %505, %v306_v49  }
 0x156   : > { %325 = vperm.xlu1 %505, %v309_v52  }
 0x1cd   : > { %v313_v53 = vpop.permute.xlu1 %312 }
 0x1ce   : > { %v320_v54 = vrot.slane %v313_v53, %v660_v10 }
 0x1d0   : > { %v322_v56 = vmul.f32 %v320_v54, %v267_v14 }
 0x1d1   : > { %v326_v55 = vpop.permute.xlu1 %325 }
 0x1d2   : > { %v333_v57 = vrot.slane %v326_v55, %v660_v10 }
 0x1d4   : > { %v335_v58 = vadd.f32 %v333_v57, %v322_v56 }
 0x1d6   : > { %336 = vst [vmem:[%s229_s28] sm:$0xff] %v335_v58 }
 0x1d7   : > { %525 = shalt.err (!%p522_p3)
}
 0x1d8   : > { %s526_s11 = scalar_lea.hbm %s350_s6, 128  ;;  %s530_s14 = scalar_lea.hbm %s717_s4, 256 }
 0x1d9   : > { %p527_p4 = scmp.ne.s32.totalorder %s350_s6, %s526_s11  ;;  %p531_p9 = scmp.lt.s32.totalorder %s350_s6, %s717_s4 }
 0x1da   : > { %p532_p10 = scmp.lt.s32.totalorder %s530_s14, %s526_s11 }
 0x1db   : > { %p528_p7 = pnand %p527_p4, %p640_p5 }
 0x1dc   : > { %p533_p11 = por %p532_p10, %p531_p9 }
 0x1dd   : > { %p529_p8 = pneg %p528_p7 }
 0x1df   : > { %p534_p12 = pnand %p533_p11, %p529_p8 }
 0x1e1   : > { %537 = shalt.err (!%p534_p12)
}
 0x1e2   : > { %464 = dma.vmem_to_hbm [thread:$0]  (%p640_p5), %s353_s29, 128, %s350_s6, %s338_s7  }
 0x1e3 PF: > { %p470_p13 = scmp.ge.s32.totalorder %s572_s18, 2  ;;  %s364_s23 = sand.u32 1, %s560_s15  }
 0x1e4   : > { %s365_s27 = scalar_lea.sflag [#allocation3], %s364_s23 }
 0x1e5   : > { %p467_p0 = pnand %p470_p13, %p644_p6 }
 0x1e7   : > { %p468_p1 = pneg %p467_p0 }
 0x1e9   : > { %555 = dma.done.wait (%p468_p1), %s365_s27, 128  }
 0x1ea   : > { %557 = vsyncadd (%p468_p1), %s365_s27, 4294967168  ;;  %p14_p2 = scmp.ge.s32.totalorder %s627_s21, 4   ;;  %s720_s15 = smov %s564_s16 }
 0x1eb   : > { %s721_s16 = smov %s568_s17  ;;  %s722_s17 = smov %s638_s24 }
 0x1ec   : > { %s723_s18 = smov %s627_s21  ;;  %16 = sbr.rel (!%p14_p2) target bundleno = 3 (0x3), region = 80 }
 0x1f1   :  { %370 = vsyncpa [#allocation3], 1 }
 0x1f2   :  { %372 = vsyncpa [#allocation3 + $0x1], 1 }

</bundles_post_ra>
